<compile_context>
chip_gen: v6e
topology: v6e:2x2x1
jax: 0.10.0
libtpu: 0.0.40
codegen_flags: <defaults>
</compile_context>

<pallas_src>
import jax
import jax.numpy as jnp
from jax.experimental import pallas as pl
from jax.experimental.pallas import tpu as pltpu


def _round_up(n: int, m: int) -> int:
    return ((n + m - 1) // m) * m


def slot_classifier_kernel(x_ref, w1_ref, w2_ref, b2_ref, h_ref, out_ref):
    # x_ref : (TM, D)       token tile (compute dtype, e.g. bf16)
    # w1_ref: (D, E_pad)    linear_slot weight, pre-transposed, resident
    # w2_ref: (E_pad, L_pad) linear weight, pre-transposed, resident
    # b2_ref: (1, L_pad)    linear bias (f32), resident
    # h_ref : (TM, E_pad)   leaky-relu'd projection (first output)
    # out_ref:(TM, L_pad)   slot logits (second output)
    x = x_ref[...]
    # First matmul on the MXU, f32 accumulation.
    h = jnp.dot(x, w1_ref[...], preferred_element_type=jnp.float32)
    # LeakyReLU(negative_slope=0.2) in f32.
    h = jnp.where(h > 0, h, 0.2 * h)
    # Dropout(p=0.0) is the identity (eval / p=0): nothing to do.
    h_ref[...] = h.astype(h_ref.dtype)
    # Second matmul (bf16 operands, f32 accumulation) + bias in f32.
    logits = jnp.dot(h.astype(w2_ref.dtype), w2_ref[...],
                     preferred_element_type=jnp.float32)
    logits = logits + b2_ref[...]
    out_ref[...] = logits.astype(out_ref.dtype)


def slot_classifier(x, w_slot, w_lin, b_lin, *,
                    compute_dtype=jnp.bfloat16, block_m=512):
    """x: (..., D). Weights in PyTorch convention:
         w_slot: (E, D)  -- linear_slot.weight
         w_lin : (L, E)  -- linear.weight
         b_lin : (L,)    -- linear.bias
       Returns (h, logits) with leading dims matching x."""
    orig_shape = x.shape
    D = orig_shape[-1]
    x2 = x.reshape(-1, D)
    M = x2.shape[0]
    E = w_slot.shape[0]
    L = w_lin.shape[0]
    out_dtype = x2.dtype

    # Lane-dense padding of the feature dims (multiples of 128).
    E_pad = _round_up(E, 128)
    L_pad = _round_up(L, 128)

    # Token tiling: TM multiple of 16 (bf16 sublane pack), pad M to a multiple.
    TM = min(block_m, _round_up(M, 16))
    M_pad = _round_up(M, TM)

    # Inputs: zero-pad tokens, cast to compute dtype (bf16 by default).
    xp = x2
    if M_pad != M:
        xp = jnp.pad(x2, ((0, M_pad - M), (0, 0)))
    xp = xp.astype(compute_dtype)

    # Weights pre-transposed to (in, out) and zero-padded lane-dense.
    w1 = jnp.zeros((D, E_pad), compute_dtype).at[:, :E].set(
        jnp.asarray(w_slot).T.astype(compute_dtype))
    w2 = jnp.zeros((E_pad, L_pad), compute_dtype).at[:E, :L].set(
        jnp.asarray(w_lin).T.astype(compute_dtype))
    b2 = jnp.zeros((1, L_pad), jnp.float32).at[0, :L].set(
        jnp.asarray(b_lin).astype(jnp.float32))

    grid = (M_pad // TM,)
    out_bytes = jnp.dtype(out_dtype).itemsize
    cd_bytes = jnp.dtype(compute_dtype).itemsize
    cost = pl.CostEstimate(
        flops=2 * M_pad * (D * E_pad + E_pad * L_pad),
        transcendentals=0,
        bytes_accessed=(M_pad * D * cd_bytes
                        + D * E_pad * cd_bytes + E_pad * L_pad * cd_bytes
                        + L_pad * 4
                        + M_pad * E_pad * out_bytes
                        + M_pad * L_pad * out_bytes),
    )

    h_pad, logits_pad = pl.pallas_call(
        slot_classifier_kernel,
        out_shape=(
            jax.ShapeDtypeStruct((M_pad, E_pad), out_dtype),
            jax.ShapeDtypeStruct((M_pad, L_pad), out_dtype),
        ),
        grid=grid,
        in_specs=[
            pl.BlockSpec((TM, D), lambda i: (i, 0)),        # x tile, pipelined
            pl.BlockSpec((D, E_pad), lambda i: (0, 0)),     # w1, resident
            pl.BlockSpec((E_pad, L_pad), lambda i: (0, 0)), # w2, resident
            pl.BlockSpec((1, L_pad), lambda i: (0, 0)),     # bias, resident
        ],
        out_specs=(
            pl.BlockSpec((TM, E_pad), lambda i: (i, 0)),
            pl.BlockSpec((TM, L_pad), lambda i: (i, 0)),
        ),
        compiler_params=pltpu.CompilerParams(
            dimension_semantics=("parallel",),   # shards M tiles across TCs on v7x
            vmem_limit_bytes=32 * 1024 * 1024,   # safe on v5e/v6e/v7x, far above need
        ),
        cost_estimate=cost,
    )(xp, w1, w2, b2)

    # Strip padding and restore leading dims.
    h = h_pad[:M, :E].reshape(*orig_shape[:-1], E)
    logits = logits_pad[:M, :L].reshape(*orig_shape[:-1], L)
    return h, logits


if __name__ == "__main__":
    # Small, module-consistent shapes: batch=2, seq=8, input_dim=32,
    # attention_embedding_size=200 (default), num_slot_labels=24.
    B, S, D = 2, 8, 32
    E = 200          # attention_embedding_size
    L = 24           # num_slot_labels

    key = jax.random.PRNGKey(0)
    kx, k1, k2, k3 = jax.random.split(key, 4)
    x = jax.random.normal(kx, (B, S, D), dtype=jnp.float32)
    w_slot = jax.random.normal(k1, (E, D), dtype=jnp.float32) * 0.05  # linear_slot.weight
    w_lin = jax.random.normal(k2, (L, E), dtype=jnp.float32) * 0.05   # linear.weight
    b_lin = jax.random.normal(k3, (L,), dtype=jnp.float32) * 0.05     # linear.bias

    h, logits = slot_classifier(x, w_slot, w_lin, b_lin)
    jax.block_until_ready((h, logits))

    # Pure-JAX f32 reference check (kernel uses bf16 inputs + f32 accumulation,
    # so compare with a relaxed tolerance).
    h_ref = x @ w_slot.T
    h_ref = jnp.where(h_ref > 0, h_ref, 0.2 * h_ref)
    logits_ref = h_ref @ w_lin.T + b_lin
    assert h.shape == (B, S, E) and logits.shape == (B, S, L)
    assert jnp.allclose(h, h_ref, atol=2e-2, rtol=2e-2)
    assert jnp.allclose(logits, logits_ref, atol=2e-2, rtol=2e-2)

    print("KERNEL_OK")
</pallas_src>

<mosaic_0001>
module attributes {stable_mosaic.version = 11 : i64} {
  func.func @slot_classifier_kernel(%arg0: i32, %arg1: memref<16x32xbf16, #tpu.memory_space<vmem>>, %arg2: memref<32x256xbf16, #tpu.memory_space<vmem>>, %arg3: memref<256x128xbf16, #tpu.memory_space<vmem>>, %arg4: memref<1x128xf32, #tpu.memory_space<vmem>>, %arg5: memref<16x256xf32, #tpu.memory_space<vmem>>, %arg6: memref<16x128xf32, #tpu.memory_space<vmem>>) attributes {dimension_semantics = [#tpu.dimension_semantics<parallel>], iteration_bounds = array<i64: 1>, scalar_prefetch = 0 : i64, scratch_operands = 0 : i64, tpu.core_type = #tpu.core_type<tc>, window_params = [{transform_indices = @transform_0, window_bounds = array<i64: 16, 32>}, {pipeline_mode = #tpu.pipeline_mode<synchronous>, transform_indices = @transform_1, window_bounds = array<i64: 32, 256>}, {pipeline_mode = #tpu.pipeline_mode<synchronous>, transform_indices = @transform_2, window_bounds = array<i64: 256, 128>}, {pipeline_mode = #tpu.pipeline_mode<synchronous>, transform_indices = @transform_3, window_bounds = array<i64: 1, 128>}, {transform_indices = @transform_4, window_bounds = array<i64: 16, 256>}, {transform_indices = @transform_5, window_bounds = array<i64: 16, 128>}]} {
    %c0 = arith.constant 0 : index
    %c0_0 = arith.constant 0 : index
    %0 = vector.load %arg1[%c0, %c0_0] : memref<16x32xbf16, #tpu.memory_space<vmem>>, vector<16x32xbf16>
    %c0_1 = arith.constant 0 : index
    %c0_2 = arith.constant 0 : index
    %1 = vector.load %arg2[%c0_1, %c0_2] : memref<32x256xbf16, #tpu.memory_space<vmem>>, vector<32x256xbf16>
    %cst = arith.constant dense<0.000000e+00> : vector<16x256xf32>
    %2 = tpu.matmul %0, %1, %cst {dimension_numbers = #tpu.dot_dimension_numbers<[1], [0], [0], [1], [0, 0, 1, 1], [], []>} : vector<16x32xbf16>, vector<32x256xbf16>, vector<16x256xf32> -> vector<16x256xf32>
    %cst_3 = arith.constant 0.000000e+00 : f32
    %3 = vector.broadcast %cst_3 : f32 to vector<16x256xf32>
    %4 = arith.cmpf ogt, %2, %3 : vector<16x256xf32>
    %cst_4 = arith.constant 2.000000e-01 : f32
    %5 = vector.broadcast %cst_4 : f32 to vector<16x256xf32>
    %6 = arith.mulf %5, %2 : vector<16x256xf32>
    %7 = arith.select %4, %2, %6 : vector<16x256xi1>, vector<16x256xf32>
    %c0_5 = arith.constant 0 : index
    %c0_6 = arith.constant 0 : index
    %8 = vector.load %arg5[%c0_5, %c0_6] : memref<16x256xf32, #tpu.memory_space<vmem>>, vector<16x256xf32>
    tpu.vector_store %arg5[%c0_5, %c0_6], %7 {strides = array<i32>} : memref<16x256xf32, #tpu.memory_space<vmem>>, vector<16x256xf32>,
    %9 = arith.truncf %7 : vector<16x256xf32> to vector<16x256xbf16>
    %c0_7 = arith.constant 0 : index
    %c0_8 = arith.constant 0 : index
    %10 = vector.load %arg3[%c0_7, %c0_8] : memref<256x128xbf16, #tpu.memory_space<vmem>>, vector<256x128xbf16>
    %cst_9 = arith.constant dense<0.000000e+00> : vector<16x128xf32>
    %11 = tpu.matmul %9, %10, %cst_9 {dimension_numbers = #tpu.dot_dimension_numbers<[1], [0], [0], [1], [0, 0, 1, 1], [], []>} : vector<16x256xbf16>, vector<256x128xbf16>, vector<16x128xf32> -> vector<16x128xf32>
    %c0_10 = arith.constant 0 : index
    %c0_11 = arith.constant 0 : index
    %12 = vector.load %arg4[%c0_10, %c0_11] : memref<1x128xf32, #tpu.memory_space<vmem>>, vector<1x128xf32>
    %13 = vector.broadcast %12 : vector<1x128xf32> to vector<16x128xf32>
    %14 = arith.addf %11, %13 : vector<16x128xf32>
    %c0_12 = arith.constant 0 : index
    %c0_13 = arith.constant 0 : index
    %15 = vector.load %arg6[%c0_12, %c0_13] : memref<16x128xf32, #tpu.memory_space<vmem>>, vector<16x128xf32>
    tpu.vector_store %arg6[%c0_12, %c0_13], %14 {strides = array<i32>} : memref<16x128xf32, #tpu.memory_space<vmem>>, vector<16x128xf32>,
    return
  }
  func.func @transform_0(%arg0: i32) -> (i32, i32) {
    %c0_i32 = arith.constant 0 : i32
    %c0_i32_0 = arith.constant 0 : i32
    return %arg0, %c0_i32 : i32, i32
  }
  func.func @transform_1(%arg0: i32) -> (i32, i32) {
    %c0_i32 = arith.constant 0 : i32
    %c0_i32_0 = arith.constant 0 : i32
    %c0_i32_1 = arith.constant 0 : i32
    return %c0_i32, %c0_i32_0 : i32, i32
  }
  func.func @transform_2(%arg0: i32) -> (i32, i32) {
    %c0_i32 = arith.constant 0 : i32
    %c0_i32_0 = arith.constant 0 : i32
    %c0_i32_1 = arith.constant 0 : i32
    return %c0_i32, %c0_i32_0 : i32, i32
  }
  func.func @transform_3(%arg0: i32) -> (i32, i32) {
    %c0_i32 = arith.constant 0 : i32
    %c0_i32_0 = arith.constant 0 : i32
    %c0_i32_1 = arith.constant 0 : i32
    return %c0_i32, %c0_i32_0 : i32, i32
  }
  func.func @transform_4(%arg0: i32) -> (i32, i32) {
    %c0_i32 = arith.constant 0 : i32
    %c0_i32_0 = arith.constant 0 : i32
    return %arg0, %c0_i32 : i32, i32
  }
  func.func @transform_5(%arg0: i32) -> (i32, i32) {
    %c0_i32 = arith.constant 0 : i32
    %c0_i32_0 = arith.constant 0 : i32
    return %arg0, %c0_i32 : i32, i32
  }
}

</mosaic_0001>

<bundles_post_ra>
// kernel: tpu_custom_call.1
= control target key start
LH: loop header
LB: loop body
LE: loop exit
PB: predicated region body
PF: predicated region fallthrough
CT: control target
= control target key end

     0   :  { %11 = vsyncpa [#allocation3], 0  ;;  %s625_s0 = inlined_call_operand.hbm [shape: bf16[16,32], index: 0, kind: input, shape index: {}]   ;;  %s626_s1 = inlined_call_operand.hbm [shape: bf16[32,256], index: 1, kind: input, shape index: {}]   ;;  %s627_s2 = inlined_call_operand.hbm [shape: bf16[256,128], index: 2, kind: input, shape index: {}]   ;;  %s628_s3 = inlined_call_operand.vmem [shape: f32[1,128], index: 3, kind: input, shape index: {}]   ;;  %s629_s4 = inlined_call_operand.hbm [shape: f32[16,256], index: 4, kind: output, shape index: {0}]   ;;  %s630_s5 = inlined_call_operand.hbm [shape: f32[16,128], index: 5, kind: output, shape index: {1}]  }
   0x1   :  { %12 = vsyncpa [#allocation6], 0 }
   0x2   :  { %13 = vsyncpa [#allocation4], 0 }
   0x3   :  { %14 = vsyncpa [#allocation10], 0  ;;  %s559_s18 = smov [#allocation5]  }
   0x4   :  { %s32_s19 = sshll.u32 %s559_s18, 4  ;;  %s33_s19 = int_to_ptr.vmem [resolvable:$true] %s32_s19 }
   0x5   :  { %s459_s20 = scalar_lea.vmem %s33_s19, 512  ;;  %p464_p1 = scmp.lt.s32.totalorder %s33_s19, %s33_s19 }
   0x6   :  { %p460_p0 = scmp.ne.s32.totalorder %s33_s19, %s459_s20  ;;  %p465_p2 = scmp.lt.s32.totalorder %s459_s20, %s459_s20 }
   0x8   :  { %p466_p3 = por %p465_p2, %p464_p1 }
   0xa   :  { %p467_p4 = pnand %p466_p3, %p460_p0 }
   0xc   :  { %470 = shalt.err (!%p467_p4)
}
   0xd   :  { %s560_s21 = smov 128   ;;  %s561_s22 = smov 8  }
   0xe   :  { %38 = dma.hbm_to_vmem [thread:$0]  %s626_s1, 512, %s33_s19, [#allocation6], %s560_s21, %s560_s21, %s561_s22  }
   0xf   :  { %s562_s25 = smov [#allocation2]  }
  0x10   :  { %s20_s26 = sshll.u32 %s562_s25, 4  ;;  %s21_s26 = int_to_ptr.vmem [resolvable:$true] %s20_s26 }
  0x11   :  { %s479_s27 = scalar_lea.vmem %s21_s26, 128  ;;  %p484_p6 = scmp.lt.s32.totalorder %s21_s26, %s21_s26 }
  0x12   :  { %p480_p5 = scmp.ne.s32.totalorder %s21_s26, %s479_s27  ;;  %p485_p7 = scmp.lt.s32.totalorder %s479_s27, %s479_s27 }
  0x14   :  { %p486_p8 = por %p485_p7, %p484_p6 }
  0x16   :  { %p487_p9 = pnand %p486_p8, %p480_p5 }
  0x18   :  { %490 = shalt.err (!%p487_p9)
}
  0x19   :  { %s563_s28 = smov 64   ;;  %s564_s29 = smov 4  }
  0x1a   :  { %26 = dma.hbm_to_vmem [thread:$0]  %s625_s0, 128, %s21_s26, [#allocation3], %s563_s28, %s563_s28, %s564_s29  }
  0x1b   :  { %s565_s7 = smov [#allocation7]  }
  0x1c   :  { %s44_s8 = sshll.u32 %s565_s7, 4  ;;  %s45_s8 = int_to_ptr.vmem [resolvable:$true] %s44_s8 }
  0x1d   :  { %s499_s1 = scalar_lea.vmem %s45_s8, 2048  ;;  %p504_p11 = scmp.lt.s32.totalorder %s45_s8, %s45_s8 }
  0x1e   :  { %p500_p10 = scmp.ne.s32.totalorder %s45_s8, %s499_s1  ;;  %p505_p12 = scmp.lt.s32.totalorder %s499_s1, %s499_s1 }
  0x20   :  { %p506_p13 = por %p505_p12, %p504_p11 }
  0x22   :  { %p507_p0 = pnand %p506_p13, %p500_p10 }
  0x24   :  { %510 = shalt.err (!%p507_p0)
}
  0x25   :  { %50 = dma.hbm_to_vmem [thread:$0]  %s627_s2, 2048, %s45_s8, [#allocation6], %s563_s28, %s563_s28, %s564_s29  }
  0x26   :  { %551 = dma.done.wait [#allocation3], 128  }
  0x27   :  { %552 = vsyncadd [#allocation3], 4294967168 }
  0x28   :  { %553 = dma.done.wait [#allocation6], 2560  }
  0x29   :  { %554 = vsyncadd [#allocation6], 4294964736  ;;  %v566_v0 = vmov 0   ;;  %v428_v1 = vld [vmem:[#allocation5 + $0x14] ss:$8 sps:$4 sm:$0xff]   ;;  %vm94_vm0 = vcmask 261120  }
  0x2a   :  { %130 = vmatprep.mubr.bf16.mxu0 %v566_v0  ;;  %v430_v2 = vld [vmem:[#allocation5 + $0x10] ss:$8 sps:$4 sm:$0xff]   ;;  %110 = vmatprep.subr.bf16.mxu0 %v428_v1  ;;  %v431_v3 = vld [vmem:[#allocation5 + $0x4] ss:$8 sps:$4 sm:$0xff]   ;;  %v433_v4 = vld [vmem:[#allocation5] ss:$8 sps:$4 sm:$0xff]  }
  0x2b   :  { %111 = vmatpush1.bf16.msra.mxu0 %v430_v2  ;;  %v434_v5 = vld [vmem:[#allocation2] sm:$0xff]   ;;  %v437_v8 = vld [vmem:[#allocation7 + $0x70] sm:$0xff]   ;;  %v439_v10 = vld [vmem:[#allocation7 + $0x68] sm:$0xff]   ;;  %s567_s0 = smov [#allocation8]  }
  0x2c   :  { %112 = vmatprep.subr.bf16.mxu0 %v431_v3  ;;  %v435_v6 = vld [vmem:[#allocation7 + $0x78] sm:$0xff]   ;;  %v438_v9 = vld [vmem:[#allocation7 + $0x30] sm:$0xff]   ;;  %v440_v11 = vld [vmem:[#allocation7 + $0x28] sm:$0xff]   ;;  %s342_s2 = sshll.u32 %s567_s0, 4  ;;  %s343_s2 = int_to_ptr.vmem [resolvable:$true] %s342_s2 }
  0x2d   :  { %v436_v7 = vld [vmem:[#allocation7 + $0x38] sm:$0xff]   ;;  %394 = vmatprep.subr.bf16.mxu1 %v435_v6  ;;  %v441_v12 = vld [vmem:[#allocation7 + $0x60] sm:$0xff]   ;;  %v445_v16 = vld [vmem:[#allocation7 + $0x50] sm:$0xff]   ;;  %s511_s11 = scalar_lea.vmem %s343_s2, 512  ;;  %p516_p2 = scmp.lt.s32.totalorder %s343_s2, %s343_s2 }
  0x2e   :  { %395 = vmatpush3.bf16.msra.mxu1 %v436_v7  ;;  %v442_v13 = vld [vmem:[#allocation7 + $0x20] sm:$0xff]   ;;  %v443_v14 = vld [vmem:[#allocation7 + $0x58] sm:$0xff]   ;;  %v446_v17 = vld [vmem:[#allocation7 + $0x10] sm:$0xff]   ;;  %p512_p1 = scmp.ne.s32.totalorder %s343_s2, %s511_s11  ;;  %p517_p3 = scmp.lt.s32.totalorder %s511_s11, %s511_s11 }
  0x2f   :  { %113 = vmatpush1.bf16.msra.mxu0 %v433_v4  ;;  %396 = vmatprep.subr.bf16.mxu1 %v437_v8  ;;  %v444_v15 = vld [vmem:[#allocation7 + $0x18] sm:$0xff]   ;;  %v447_v18 = vld [vmem:[#allocation7 + $0x48] sm:$0xff]   ;;  %v449_v20 = vld [vmem:[#allocation7 + $0x40] sm:$0xff]  }
  0x30   :  { %v448_v19 = vld [vmem:[#allocation7 + $0x8] sm:$0xff]   ;;  %v450_v21 = vld [vmem:[#allocation7] sm:$0xff]   ;;  %p518_p4 = por %p517_p3, %p516_p2 }
  0x32   :  { %376 = vmatmul.mubr.msk.bf16.vlgmr.msra.gmra.mxu0 %vm94_vm0, %v434_v5  ;;  %397 = vmatpush3.bf16.msra.mxu1 %v438_v9  ;;  %p519_p5 = pnand %p518_p4, %p512_p1 }
  0x33   :  { %398 = vmatprep.subr.bf16.mxu1 %v439_v10 }
  0x36   :  { %399 = vmatpush3.bf16.msra.mxu1 %v440_v11 }
  0x37   :  { %400 = vmatprep.subr.bf16.mxu1 %v441_v12 }
  0x3a   :  { %401 = vmatpush3.bf16.msra.mxu1 %v442_v13 }
  0x3b   :  { %402 = vmatprep.subr.bf16.mxu1 %v443_v14 }
  0x3e   :  { %403 = vmatpush3.bf16.msra.mxu1 %v444_v15 }
  0x3f   :  { %404 = vmatprep.subr.bf16.mxu1 %v445_v16 }
  0x42   :  { %405 = vmatpush3.bf16.msra.mxu1 %v446_v17 }
  0x43   :  { %406 = vmatprep.subr.bf16.mxu1 %v447_v18 }
  0x46   :  { %407 = vmatpush3.bf16.msra.mxu1 %v448_v19 }
  0x47   :  { %408 = vmatprep.subr.bf16.mxu1 %v449_v20 }
  0x4a   :  { %409 = vmatpush3.bf16.msra.mxu1 %v450_v21 }
  0xf2   :  { %v132_v22 = vpop.f32.mrf.mxu0 }
  0xf3   :  { %vm141_vm1 = vcmp.gt.f32.partialorder %v132_v22, 0.0  ;;  %v145_v23 = vmul.f32 0.2, %v132_v22 }
  0xf4   :  { %v134_v24 = vpop.f32.mrf.mxu0 }
  0xf5   :  { %v149_v25 = vsel %vm141_vm1, %v132_v22, %v145_v23  ;;  %v146_v26 = vmul.f32 0.2, %v134_v24  ;;  %vm142_vm2 = vcmp.gt.f32.partialorder %v134_v24, 0.0 }
  0xf6   :  { %153 = vst [vmem:[#allocation8] sm:$0xff] %v149_v25  ;;  %v136_v27 = vpop.f32.mrf.mxu0 }
  0xf7   :  { %vm143_vm3 = vcmp.gt.f32.partialorder %v136_v27, 0.0  ;;  %v147_v28 = vmul.f32 0.2, %v136_v27  ;;  %v150_v29 = vsel %vm142_vm2, %v134_v24, %v146_v26 }
  0xf8   :  { %v138_v30 = vpop.f32.mrf.mxu0  ;;  %154 = vst [vmem:[#allocation8 + $0x8] sm:$0xff] %v150_v29 }
  0xf9   :  { %v151_v31 = vsel %vm143_vm3, %v136_v27, %v147_v28  ;;  %vm144_vm4 = vcmp.gt.f32.partialorder %v138_v30, 0.0  ;;  %v148_v32 = vmul.f32 0.2, %v138_v30 }
  0xfa   :  { %155 = vst [vmem:[#allocation8 + $0x10] sm:$0xff] %v151_v31  ;;  %v157_v35 = vpack.c.bf16 %v151_v31, %v149_v25 }
  0xfb   :  { %v152_v33 = vsel %vm144_vm4, %v138_v30, %v148_v32 }
  0xfc   :  { %156 = vst [vmem:[#allocation8 + $0x18] sm:$0xff] %v152_v33  ;;  %v158_v34 = vpack.c.bf16 %v152_v33, %v150_v29 }
  0xfe   :  { %326 = vmatprep.mubr.bf16.mxu1 %v158_v34 }
  0xff   :  { %327 = vmatmul.mubr.bf16.vlgmr.msra.gmra.mxu1 %v157_v35 }
 0x100   :  { %522 = shalt.err (!%p519_p5)
}
 0x101   :  { %s568_s12 = smov 256   ;;  %s569_s13 = smov 16   ;;  %v377_v37 = vld [vmem:[%s628_s3] ss:$0 sm:$0xff] }
 0x102   :  { %348 = dma.vmem_to_hbm [thread:$0]  %s343_s2, 512, %s629_s4, [#allocation4], %s568_s12, %s568_s12, %s569_s13  }
 0x103   :  { %s570_s18 = smov [#allocation9]  }
 0x104   :  { %s354_s19 = sshll.u32 %s570_s18, 4  ;;  %s355_s19 = int_to_ptr.vmem [resolvable:$true] %s354_s19 }
 0x105   :  { %s531_s20 = scalar_lea.vmem %s355_s19, 256  ;;  %p536_p7 = scmp.lt.s32.totalorder %s355_s19, %s355_s19 }
 0x106   :  { %p532_p6 = scmp.ne.s32.totalorder %s355_s19, %s531_s20  ;;  %p537_p8 = scmp.lt.s32.totalorder %s531_s20, %s531_s20 }
 0x108   :  { %p538_p9 = por %p537_p8, %p536_p7 }
 0x10a   :  { %p539_p10 = pnand %p538_p9, %p532_p6 }
 0x1bf   :  { %v410_v36 = vpop.f32.mrf.mxu1 }
 0x1c1   :  { %v411_v38 = vpop.f32.mrf.mxu1 }
 0x1c2   :  { %v412_v39 = vadd.f32 %v411_v38, %v410_v36 }
 0x1c3   :  { %v413_v40 = vpop.f32.mrf.mxu1 }
 0x1c4   :  { %v329_v41 = vadd.f32 %v412_v39, %v377_v37 }
 0x1c5   :  { %v414_v42 = vpop.f32.mrf.mxu1 }
 0x1c6   :  { %335 = vst [vmem:[#allocation9] sm:$0xff] %v329_v41  ;;  %v415_v43 = vadd.f32 %v414_v42, %v413_v40 }
 0x1c8   :  { %v332_v44 = vadd.f32 %v415_v43, %v377_v37 }
 0x1ca   :  { %336 = vst [vmem:[#allocation9 + $0x8] sm:$0xff] %v332_v44 }
 0x1cb   :  { %542 = shalt.err (!%p539_p10)
}
 0x1cc   :  { %360 = dma.vmem_to_hbm [thread:$0]  %s355_s19, 256, %s630_s5, [#allocation10], %s560_s21, %s560_s21, %s561_s22  }
 0x1cd   :  { %555 = dma.done.wait [#allocation4], 512  }
 0x1ce   :  { %556 = vsyncadd [#allocation4], 4294966784 }
 0x1cf   :  { %557 = dma.done.wait [#allocation10], 256  }
 0x1d0   :  { %558 = vsyncadd [#allocation10], 4294967040 }
 0x1d1   :  { %367 = vsyncpa [#allocation3], 1 }
 0x1d2   :  { %368 = vsyncpa [#allocation6], 1 }
 0x1d3   :  { %369 = vsyncpa [#allocation4], 1 }
 0x1d4   :  { %370 = vsyncpa [#allocation10], 1 }

</bundles_post_ra>
